<compile_context>
chip_gen: v7x
topology: tpu7x:2x2x1
jax: 0.10.0
libtpu: 0.0.40
codegen_flags: <defaults>
</compile_context>

<pallas_src>
import functools

import jax
import jax.numpy as jnp
from jax import lax
from jax.experimental import pallas as pl
from jax.experimental.pallas import tpu as pltpu


_VMEM_BUDGET_PER_BUF = 8 * 1024 * 1024   # bytes per input block (one pipeline buffer)
_VMEM_LIMIT = 48 * 1024 * 1024           # explicit scoped-VMEM limit (safe v5e..v7x)


def _round_up(x: int, m: int) -> int:
    return ((x + m - 1) // m) * m


def _choose_cols(shape, n_elems: int) -> int:
    # Lane-dense free reshape when possible; otherwise the natural trailing dim
    # (also a free reshape since it always divides n_elems).
    for c in (512, 256, 128):
        if n_elems % c == 0:
            return c
    if len(shape) >= 2:
        return int(shape[-1])
    return 1


def _quantile_loss_kernel(labels_ref, preds_ref, out_ref, *,
                          quantile: float, rows_block: int, chunk_rows: int,
                          total_rows: int, mask_rows: bool):
    cols = labels_ref.shape[-1]
    n_chunks = rows_block // chunk_rows
    q = float(quantile)
    qm1 = q - 1.0

    if mask_rows:
        # Hoisted out of the loop (JAX does not CSE broadcast/iota).
        block_row0 = pl.program_id(0) * rows_block
        base_rows = block_row0 + lax.broadcasted_iota(jnp.int32, (chunk_rows, 1), 0)

    def body(c, acc):
        r0 = pl.multiple_of(c * chunk_rows, chunk_rows)
        lab = labels_ref[pl.ds(r0, chunk_rows), :].astype(jnp.float32)
        prd = preds_ref[pl.ds(r0, chunk_rows), :].astype(jnp.float32)
        err = lab - prd
        loss = jnp.maximum(qm1 * err, q * err)      # pinball loss
        if mask_rows:
            # Rows past the real array end hold unspecified VMEM data; zero them.
            valid = (base_rows + r0) < total_rows
            loss = jnp.where(valid, loss, 0.0)
        return acc + loss

    acc = lax.fori_loop(0, n_chunks, body,
                        jnp.zeros((chunk_rows, cols), jnp.float32))
    # Single cross-lane reduce per block; partial sum goes out as an SMEM scalar.
    out_ref[0, 0] = jnp.sum(acc)


def quantile_loss(labels: jax.Array, predictions: jax.Array,
                  quantile: float) -> jax.Array:
    """Scalar mean pinball loss, computed in a Pallas TPU kernel."""
    assert labels.shape == predictions.shape
    n_elems = 1
    for d in labels.shape:
        n_elems *= int(d)
    assert n_elems > 0

    itemsize = jnp.dtype(labels.dtype).itemsize
    cols = _choose_cols(labels.shape, n_elems)
    rows_total = n_elems // cols                      # exact by construction

    # Conservative VMEM bytes per slab row (minor dim padded to a lane tile).
    vmem_row_bytes = _round_up(cols, 128) * 4
    align = max(8, 32 // itemsize)                    # sublane tile for the dtype
    rows_cap = max(align, (_VMEM_BUDGET_PER_BUF // max(vmem_row_bytes, 1))
                   // align * align)
    rows_block = min(rows_cap, _round_up(rows_total, align))
    chunk_rows = next(c for c in (32, 16, 8) if rows_block % c == 0)
    num_blocks = pl.cdiv(rows_total, rows_block)
    mask_rows = (rows_total % rows_block) != 0

    # Pathologically wide trailing dim: one block row would blow the VMEM
    # budget — fall back to a fused XLA reduction (identical semantics).
    if 4 * rows_block * vmem_row_bytes > _VMEM_LIMIT - (4 << 20):
        err = labels.astype(jnp.float32) - predictions.astype(jnp.float32)
        loss = jnp.maximum((quantile - 1.0) * err, quantile * err)
        return jnp.sum(loss) / jnp.float32(n_elems)

    # Free bitcast reshapes — no padded copies, no extra HBM traffic.
    labels2d = labels.reshape(rows_total, cols)
    preds2d = predictions.reshape(rows_total, cols)

    kernel = functools.partial(
        _quantile_loss_kernel, quantile=float(quantile), rows_block=rows_block,
        chunk_rows=chunk_rows, total_rows=rows_total, mask_rows=mask_rows)

    partials = pl.pallas_call(
        kernel,
        out_shape=jax.ShapeDtypeStruct((num_blocks, 1), jnp.float32),
        grid=(num_blocks,),
        in_specs=[
            pl.BlockSpec((rows_block, cols), lambda i: (i, 0)),
            pl.BlockSpec((rows_block, cols), lambda i: (i, 0)),
        ],
        out_specs=pl.BlockSpec((1, 1), lambda i: (i, 0),
                               memory_space=pltpu.MemorySpace.SMEM),
        compiler_params=pltpu.CompilerParams(
            dimension_semantics=("parallel",),
            vmem_limit_bytes=_VMEM_LIMIT),
        cost_estimate=pl.CostEstimate(
            flops=3 * n_elems,
            transcendentals=0,
            bytes_accessed=2 * n_elems * itemsize + num_blocks * 4),
    )(labels2d, preds2d)

    # Tiny final combine + mean (num_blocks partial sums) in the wrapper.
    return jnp.sum(partials) / jnp.float32(n_elems)


if __name__ == "__main__":
    # Deterministic example inputs: batch=16, forecast_length=128.
    forecast_length = 128
    batch = 16
    quantile = 0.9

    key = jax.random.PRNGKey(0)
    k1, k2 = jax.random.split(key)
    labels = jax.random.normal(k1, (batch, forecast_length), dtype=jnp.float32)
    predictions = jax.random.normal(k2, (batch, forecast_length), dtype=jnp.float32)

    loss_fn = jax.jit(quantile_loss, static_argnames=("quantile",))
    result = jax.block_until_ready(loss_fn(labels, predictions, quantile=quantile))

    # Pure-JAX reference (mirrors the PyTorch forward exactly).
    err = labels - predictions
    ref = jnp.mean(jnp.maximum((quantile - 1.0) * err, quantile * err))

    assert jnp.allclose(result, ref, rtol=1e-5, atol=1e-6), (result, ref)
    print("KERNEL_OK")
</pallas_src>

<mosaic_0001>
module attributes {stable_mosaic.version = 11 : i64} {
  func.func @_quantile_loss_kernel(%arg0: i32, %arg1: memref<8x512xf32, #tpu.memory_space<vmem>>, %arg2: memref<8x512xf32, #tpu.memory_space<vmem>>, %arg3: memref<1x1xf32, #tpu.memory_space<smem>>) attributes {dimension_semantics = [#tpu.dimension_semantics<parallel>], iteration_bounds = array<i64: 1>, scalar_prefetch = 0 : i64, scratch_operands = 0 : i64, tpu.core_type = #tpu.core_type<tc>, window_params = [{transform_indices = @transform_0, window_bounds = array<i64: 8, 512>}, {transform_indices = @transform_1, window_bounds = array<i64: 8, 512>}, {transform_indices = @transform_2, window_bounds = array<i64: 1, 1>}]} {
    %c8_i32 = arith.constant 8 : i32
    %0 = arith.muli %arg0, %c8_i32 : i32
    %1 = tpu.iota {dimensions = array<i32: 0>} : vector<8x1xi32>
    %2 = vector.broadcast %0 : i32 to vector<8x1xi32>
    %3 = arith.addi %2, %1 : vector<8x1xi32>
    %cst = arith.constant 0.000000e+00 : f32
    %4 = vector.broadcast %cst : f32 to vector<8x512xf32>
    %c0_i32 = arith.constant 0 : i32
    %c8_i32_0 = arith.constant 8 : i32
    %5 = arith.muli %c0_i32, %c8_i32_0 : i32
    %6 = tpu.assume_multiple %5, 8 : i32
    %7 = arith.index_cast %6 : i32 to index
    %c0 = arith.constant 0 : index
    %8 = vector.load %arg1[%7, %c0] : memref<8x512xf32, #tpu.memory_space<vmem>>, vector<8x512xf32>
    %9 = arith.index_cast %6 : i32 to index
    %c0_1 = arith.constant 0 : index
    %10 = vector.load %arg2[%9, %c0_1] : memref<8x512xf32, #tpu.memory_space<vmem>>, vector<8x512xf32>
    %11 = arith.subf %8, %10 : vector<8x512xf32>
    %cst_2 = arith.constant -1.000000e-01 : f32
    %12 = vector.broadcast %cst_2 : f32 to vector<8x512xf32>
    %13 = arith.mulf %12, %11 : vector<8x512xf32>
    %cst_3 = arith.constant 0.899999976 : f32
    %14 = vector.broadcast %cst_3 : f32 to vector<8x512xf32>
    %15 = arith.mulf %14, %11 : vector<8x512xf32>
    %16 = arith.maximumf %13, %15 : vector<8x512xf32>
    %17 = vector.broadcast %6 : i32 to vector<8x1xi32>
    %18 = arith.addi %3, %17 : vector<8x1xi32>
    %c4_i32 = arith.constant 4 : i32
    %19 = vector.broadcast %c4_i32 : i32 to vector<8x1xi32>
    %20 = arith.cmpi slt, %18, %19 : vector<8x1xi32>
    %cst_4 = arith.constant 0.000000e+00 : f32
    %21 = vector.shape_cast %20 : vector<8x1xi1> to vector<8x1xi1>
    %22 = vector.broadcast %21 : vector<8x1xi1> to vector<8x512xi1>
    %23 = vector.broadcast %cst_4 : f32 to vector<8x512xf32>
    %24 = arith.select %22, %16, %23 : vector<8x512xi1>, vector<8x512xf32>
    %25 = arith.addf %4, %24 : vector<8x512xf32>
    %c1_i32 = arith.constant 1 : i32
    %26 = vector.shape_cast %25 : vector<8x512xf32> to vector<1x8x512xf32>
    %cst_5 = arith.constant dense<0.000000e+00> : vector<1xf32>
    %27 = vector.multi_reduction <add>, %26, %cst_5 [1, 2] : vector<1x8x512xf32> to vector<1xf32>
    %28 = vector.shape_cast %27 : vector<1xf32> to vector<1x1x1xf32>
    %29 = vector.extract %28[0, 0, 0] : f32 from vector<1x1x1xf32>
    %c0_6 = arith.constant 0 : index
    %c0_7 = arith.constant 0 : index
    %30 = memref.load %arg3[%c0_6, %c0_7] : memref<1x1xf32, #tpu.memory_space<smem>>
    memref.store %29, %arg3[%c0_6, %c0_7] : memref<1x1xf32, #tpu.memory_space<smem>>
    return
  }
  func.func @transform_0(%arg0: i32) -> (i32, i32) {
    %c0_i32 = arith.constant 0 : i32
    %c0_i32_0 = arith.constant 0 : i32
    return %arg0, %c0_i32 : i32, i32
  }
  func.func @transform_1(%arg0: i32) -> (i32, i32) {
    %c0_i32 = arith.constant 0 : i32
    %c0_i32_0 = arith.constant 0 : i32
    return %arg0, %c0_i32 : i32, i32
  }
  func.func @transform_2(%arg0: i32) -> (i32, i32) {
    %c0_i32 = arith.constant 0 : i32
    %c0_i32_0 = arith.constant 0 : i32
    return %arg0, %c0_i32 : i32, i32
  }
}

</mosaic_0001>

<bundles_post_ra>
// kernel: quantile_loss.1
= control target key start
LH: loop header
LB: loop body
LE: loop exit
PB: predicated region body
PF: predicated region fallthrough
CT: control target
= control target key end

     0   :  { %v13_v0 = vlaneseq  ;;  %s165_s0 = inlined_call_operand.vmem [shape: f32[4,512], index: 0, kind: input, shape index: {}]   ;;  %s166_s1 = inlined_call_operand.vmem [shape: f32[4,512], index: 1, kind: input, shape index: {}]   ;;  %s167_s2 = inlined_call_operand.hbm [shape: f32[1,1], index: 2, kind: output, shape index: {}]  }
   0x1   :  { %v20_v1 = vld [vmem:[%s165_s0] sm:$0xff]  ;;  %v21_v2 = vld [vmem:[%s165_s0 + $0x8] sm:$0xff]  ;;  %v22_v3 = vld [vmem:[%s165_s0 + $0x10] sm:$0xff] }
   0x2   :  { %v23_v4 = vld [vmem:[%s165_s0 + $0x18] sm:$0xff]  ;;  %v26_v5 = vld [vmem:[%s166_s1] sm:$0xff]  ;;  %v27_v6 = vld [vmem:[%s166_s1 + $0x8] sm:$0xff] }
   0x3   :  { %v28_v7 = vld [vmem:[%s166_s1 + $0x10] sm:$0xff]  ;;  %v29_v8 = vld [vmem:[%s166_s1 + $0x18] sm:$0xff]  ;;  %v30_v9 = vsub.f32 %v20_v1, %v26_v5  ;;  %v31_v10 = vsub.f32 %v21_v2, %v27_v6 }
   0x4   :  { %7 = vsyncpa [#allocation3], 0  ;;  %v14_v11 = vshrl.u32 %v13_v0, 7  ;;  %v32_v12 = vsub.f32 %v22_v3, %v28_v7  ;;  %v33_v13 = vsub.f32 %v23_v4, %v29_v8  ;;  %s101_s26 = scalar_lea.hbm %s167_s2, 16 }
   0x5   :  { %v34_v14 = vmul.f32 -0.1, %v30_v9  ;;  %v35_v15 = vmul.f32 -0.1, %v31_v10  ;;  %v38_v16 = vmul.f32 0.9, %v30_v9  ;;  %p102_p0 = scmp.ne.s32.totalorder %s167_s2, %s101_s26  ;;  %p105_p1 = scmp.lt.u32.totalorder %s101_s26, %s167_s2 }
   0x6   :  { %v36_v17 = vmul.f32 -0.1, %v32_v12  ;;  %v37_v18 = vmul.f32 -0.1, %v33_v13  ;;  %v39_v19 = vmul.f32 0.9, %v31_v10 }
   0x7   :  { %v40_v20 = vmul.f32 0.9, %v32_v12  ;;  %v41_v21 = vmul.f32 0.9, %v33_v13  ;;  %v42_v22 = vmax.f32 %v34_v14, %v38_v16  ;;  %vm48_vm0 = vcmp.lt.s32.totalorder %v14_v11, 4  ;;  %p107_p2 = pnand %p105_p1, %p102_p0 }
   0x8   :  { %v43_v23 = vmax.f32 %v35_v15, %v39_v19 }
   0x9   :  { %v44_v24 = vmax.f32 %v36_v17, %v40_v20  ;;  %v45_v25 = vmax.f32 %v37_v18, %v41_v21 }
   0xb   :  { %v55_v26 = vcombine.low %v42_v22, %v44_v24  ;;  %v56_v27 = vcombine.high %v42_v22, %v44_v24  ;;  %v57_v28 = vcombine.low %v43_v23, %v45_v25  ;;  %v58_v29 = vcombine.high %v43_v23, %v45_v25 }
   0xd   :  { %v63_v30 = vsel %vm48_vm0, %v55_v26, 0.0  ;;  %v64_v31 = vsel %vm48_vm0, %v56_v27, 0.0  ;;  %v65_v32 = vsel %vm48_vm0, %v57_v28, 0.0  ;;  %v66_v34 = vsel %vm48_vm0, %v58_v29, 0.0 }
   0xe   :  { %v71_v33 = vadd.f32 %v64_v31, %v63_v30 }
  0x10   :  { %v72_v35 = vadd.f32 %v71_v33, %v65_v32 }
  0x12   :  { %v73_v36 = vadd.f32 %v72_v35, %v66_v34 }
  0x14   :  { %74 = vadd.xlane.f32.xlu0 %v73_v36 }
  0xa1   :  { %v75_v37 = vpop.xlane.xlu0 %74 }
  0xa2   :  { %v76_v38 = vrot.slane %v75_v37, 4 }
  0xa4   :  { %v77_v39 = vadd.f32 %v76_v38, %v75_v37 }
  0xa6   :  { %v78_v40 = vrot.slane %v77_v39, 2 }
  0xa8   :  { %v79_v41 = vadd.f32 %v78_v40, %v77_v39 }
  0xaa   :  { %v80_v42 = vrot.slane %v79_v41, 1 }
  0xac   :  { %v81_v43 = vadd.f32 %v80_v42, %v79_v41 }
  0xae   :  { %98 = vpush %v81_v43 }
  0xdf   :  { %s99_s0 = spop %98 }
  0xe0   :  { %84 = sst [smem:[#allocation2]] %s99_s0 }
  0xe1   :  { %110 = shalt.err (!%p107_p2)
}
  0xe2   :  { %s113_s3 = smov [#allocation2]  }
  0xe3   :  { %92 = dma.smem_to_hbm %s113_s3, 16, %s167_s2, [#allocation3]  }
  0xe4   :  { %111 = dma.done.wait [#allocation3], 16  }
  0xe5   :  { %112 = vsyncadd [#allocation3], 4294967280 }
  0xe6   :  { %96 = sfence }
  0xe7   :  { %97 = vsyncpa [#allocation3], 1 }

</bundles_post_ra>
